<compile_context>
chip_gen: v7x
topology: tpu7x:2x2x1
jax: 0.10.0
libtpu: 0.0.40
codegen_flags: <defaults>
</compile_context>

<pallas_src>
import jax
import jax.numpy as jnp
from jax.experimental import pallas as pl
from jax.experimental.pallas import tpu as pltpu


def feature_mlp_kernel(x_ref, w1_ref, b1_ref, w2_ref, b2_ref, o_ref, h_ref):
    compute_dtype = w1_ref.dtype
    # Cast x to the MXU-native dtype in-kernel (no extra HBM pass in the
    # wrapper); matmuls accumulate in f32, bias add / ReLU in f32.
    x = x_ref[...].astype(compute_dtype)
    h = jnp.dot(x, w1_ref[...], preferred_element_type=jnp.float32)
    # Stage ReLU(fc1) in VMEM already cast to the compute dtype (bf16 scratch).
    h_ref[...] = jnp.maximum(h + b1_ref[...], 0.0).astype(h_ref.dtype)
    # fc2 + ReLU
    h2 = jnp.dot(h_ref[...], w2_ref[...], preferred_element_type=jnp.float32)
    o_ref[...] = jnp.maximum(h2 + b2_ref[...], 0.0).astype(o_ref.dtype)


def _round_up(x, m):
    return ((x + m - 1) // m) * m


def prepare_params(params, compute_dtype=jnp.bfloat16):
    """Cast matmul weights to the MXU dtype once, outside the per-call path."""
    w1, b1, w2, b2 = params
    return (w1.astype(compute_dtype), jnp.asarray(b1, jnp.float32),
            w2.astype(compute_dtype), jnp.asarray(b2, jnp.float32))


def feature_mlp(x, params, *, batch_tile=1024, compute_dtype=jnp.bfloat16,
                out_dtype=None):
    """x: (B, input_dim). Returns (B, hidden_dim) in `out_dtype` (default x.dtype)."""
    w1, b1, w2, b2 = params
    B, in_dim = x.shape
    hidden = w1.shape[1]
    assert w1.shape == (in_dim, hidden)
    assert w2.shape == (hidden, hidden)
    out_dtype = x.dtype if out_dtype is None else out_dtype

    # --- batch tile selection ---------------------------------------------
    bt = batch_tile
    if B > 256:
        # keep the grid length >= 2 so a "parallel" batch axis can feed both
        # TensorCores on v7x (v5e/v6e have one TC; this is harmless there).
        bt = min(bt, _round_up(pl.cdiv(B, 2), 256))
    # sublane dim must be a multiple of 8; don't allocate a tile bigger than B.
    bt = max(8, min(bt, _round_up(B, 8)))
    num_tiles = pl.cdiv(B, bt)   # last block may be partial -> masked store

    # Weights in compute dtype (no-op if prepare_params was used), biases f32.
    w1_c = w1 if w1.dtype == compute_dtype else w1.astype(compute_dtype)
    w2_c = w2 if w2.dtype == compute_dtype else w2.astype(compute_dtype)
    b1_2d = jnp.asarray(b1, jnp.float32).reshape(1, hidden)
    b2_2d = jnp.asarray(b2, jnp.float32).reshape(1, hidden)

    full = lambda *shape: pl.BlockSpec(shape, lambda i: (0,) * len(shape))
    nbytes = lambda a: a.size * a.dtype.itemsize

    cost = pl.CostEstimate(
        flops=2 * B * (in_dim * hidden + hidden * hidden),
        transcendentals=0,
        bytes_accessed=(nbytes(x) + nbytes(w1_c) + nbytes(w2_c)
                        + nbytes(b1_2d) + nbytes(b2_2d)
                        + B * hidden * jnp.dtype(out_dtype).itemsize),
    )

    return pl.pallas_call(
        feature_mlp_kernel,
        out_shape=jax.ShapeDtypeStruct((B, hidden), out_dtype),
        grid_spec=pltpu.PrefetchScalarGridSpec(
            num_scalar_prefetch=0,
            grid=(num_tiles,),
            in_specs=[
                pl.BlockSpec((bt, in_dim), lambda i: (i, 0)),  # x tile (orig dtype)
                full(in_dim, hidden),   # w1 (grid-invariant, VMEM resident)
                full(1, hidden),        # b1
                full(hidden, hidden),   # w2
                full(1, hidden),        # b2
            ],
            out_specs=pl.BlockSpec((bt, hidden), lambda i: (i, 0)),
            scratch_shapes=[pltpu.VMEM((bt, hidden), compute_dtype)],
        ),
        compiler_params=pltpu.CompilerParams(
            dimension_semantics=("parallel",),   # shard batch tiles (megacore)
            vmem_limit_bytes=48 * 1024 * 1024,   # fits v7x's 64 MiB VMEM
        ),
        cost_estimate=cost,
    )(x, w1_c, b1_2d, w2_c, b2_2d)


def init_params(key, input_dim, hidden_dim=128):
    """PyTorch nn.Linear-style init: uniform(-1/sqrt(fan_in), +1/sqrt(fan_in))."""
    def linear(k, fan_in, fan_out):
        kw, kb = jax.random.split(k)
        bound = 1.0 / jnp.sqrt(fan_in)
        # stored as (in, out) so the kernel does x @ W + b
        w = jax.random.uniform(kw, (fan_in, fan_out), jnp.float32, -bound, bound)
        b = jax.random.uniform(kb, (1, fan_out), jnp.float32, -bound, bound)
        return w, b

    k1, k2 = jax.random.split(key)
    w1, b1 = linear(k1, input_dim, hidden_dim)
    w2, b2 = linear(k2, hidden_dim, hidden_dim)
    return (w1, b1, w2, b2)


def feature_mlp_ref_f32(x, params):
    """Pure-f32 reference (matches the PyTorch module's math)."""
    w1, b1, w2, b2 = params
    h = jnp.maximum(x @ w1 + b1, 0.0)
    return jnp.maximum(h @ w2 + b2, 0.0)


def feature_mlp_ref_matched(x, params, compute_dtype=jnp.bfloat16):
    """Same precision recipe as the kernel (bf16 operands + bf16 staged h,
    f32 accumulation, f32 bias/ReLU)."""
    w1, b1, w2, b2 = params
    h = jnp.dot(x.astype(compute_dtype), w1.astype(compute_dtype),
                preferred_element_type=jnp.float32)
    h = jnp.maximum(h + b1.reshape(1, -1), 0.0).astype(compute_dtype)
    o = jnp.dot(h, w2.astype(compute_dtype),
                preferred_element_type=jnp.float32)
    return jnp.maximum(o + b2.reshape(1, -1), 0.0)


if __name__ == "__main__":
    key = jax.random.PRNGKey(0)
    k_params, k_x1, k_x2 = jax.random.split(key, 3)

    INPUT_DIM = 512
    HIDDEN_DIM = 128   # module default hidden_dim=128

    params_f32 = init_params(k_params, INPUT_DIM, HIDDEN_DIM)
    params_dev = prepare_params(params_f32)   # one-time bf16 cast of weights

    # --- case 1: small batch (single exact tile) ---------------------------
    B1 = 16
    x1 = jax.random.normal(k_x1, (B1, INPUT_DIM), jnp.float32)
    out1 = jax.block_until_ready(feature_mlp(x1, params_dev))
    assert out1.shape == (B1, HIDDEN_DIM), out1.shape

    ref1_m = feature_mlp_ref_matched(x1, params_f32)
    assert jnp.allclose(out1, ref1_m, atol=1e-3, rtol=1e-3), (
        float(jnp.max(jnp.abs(out1 - ref1_m))))
    ref1_f = feature_mlp_ref_f32(x1, params_f32)
    assert jnp.allclose(out1, ref1_f, atol=1e-1, rtol=1e-1), (
        float(jnp.max(jnp.abs(out1 - ref1_f))))

    # --- case 2: partial last tile (exercises boundary masking, no padding) -
    B2 = 200
    x2 = jax.random.normal(k_x2, (B2, INPUT_DIM), jnp.float32)
    out2 = jax.block_until_ready(feature_mlp(x2, params_dev, batch_tile=128))
    assert out2.shape == (B2, HIDDEN_DIM), out2.shape

    ref2_m = feature_mlp_ref_matched(x2, params_f32)
    assert jnp.allclose(out2, ref2_m, atol=1e-3, rtol=1e-3), (
        float(jnp.max(jnp.abs(out2 - ref2_m))))

    print("KERNEL_OK")
</pallas_src>

<mosaic_0001>
module attributes {stable_mosaic.version = 11 : i64} {
  func.func @feature_mlp_kernel(%arg0: i32, %arg1: memref<16x512xf32, #tpu.memory_space<vmem>>, %arg2: memref<512x128xbf16, #tpu.memory_space<vmem>>, %arg3: memref<1x128xf32, #tpu.memory_space<vmem>>, %arg4: memref<128x128xbf16, #tpu.memory_space<vmem>>, %arg5: memref<1x128xf32, #tpu.memory_space<vmem>>, %arg6: memref<16x128xf32, #tpu.memory_space<vmem>>, %arg7: memref<16x128xbf16, #tpu.memory_space<vmem>>) attributes {dimension_semantics = [#tpu.dimension_semantics<parallel>], iteration_bounds = array<i64: 1>, scalar_prefetch = 0 : i64, scratch_operands = 1 : i64, tpu.core_type = #tpu.core_type<tc>, window_params = [{transform_indices = @transform_0, window_bounds = array<i64: 16, 512>}, {pipeline_mode = #tpu.pipeline_mode<synchronous>, transform_indices = @transform_1, window_bounds = array<i64: 512, 128>}, {pipeline_mode = #tpu.pipeline_mode<synchronous>, transform_indices = @transform_2, window_bounds = array<i64: 1, 128>}, {pipeline_mode = #tpu.pipeline_mode<synchronous>, transform_indices = @transform_3, window_bounds = array<i64: 128, 128>}, {pipeline_mode = #tpu.pipeline_mode<synchronous>, transform_indices = @transform_4, window_bounds = array<i64: 1, 128>}, {transform_indices = @transform_5, window_bounds = array<i64: 16, 128>}]} {
    %c0 = arith.constant 0 : index
    %c0_0 = arith.constant 0 : index
    %0 = vector.load %arg1[%c0, %c0_0] : memref<16x512xf32, #tpu.memory_space<vmem>>, vector<16x512xf32>
    %1 = arith.truncf %0 : vector<16x512xf32> to vector<16x512xbf16>
    %c0_1 = arith.constant 0 : index
    %c0_2 = arith.constant 0 : index
    %2 = vector.load %arg2[%c0_1, %c0_2] : memref<512x128xbf16, #tpu.memory_space<vmem>>, vector<512x128xbf16>
    %cst = arith.constant dense<0.000000e+00> : vector<16x128xf32>
    %3 = tpu.matmul %1, %2, %cst {dimension_numbers = #tpu.dot_dimension_numbers<[1], [0], [0], [1], [0, 0, 1, 1], [], []>} : vector<16x512xbf16>, vector<512x128xbf16>, vector<16x128xf32> -> vector<16x128xf32>
    %c0_3 = arith.constant 0 : index
    %c0_4 = arith.constant 0 : index
    %4 = vector.load %arg3[%c0_3, %c0_4] : memref<1x128xf32, #tpu.memory_space<vmem>>, vector<1x128xf32>
    %5 = vector.broadcast %4 : vector<1x128xf32> to vector<16x128xf32>
    %6 = arith.addf %3, %5 : vector<16x128xf32>
    %cst_5 = arith.constant 0.000000e+00 : f32
    %7 = vector.broadcast %cst_5 : f32 to vector<16x128xf32>
    %8 = arith.maximumf %6, %7 : vector<16x128xf32>
    %9 = arith.truncf %8 : vector<16x128xf32> to vector<16x128xbf16>
    %c0_6 = arith.constant 0 : index
    %c0_7 = arith.constant 0 : index
    %10 = vector.load %arg7[%c0_6, %c0_7] : memref<16x128xbf16, #tpu.memory_space<vmem>>, vector<16x128xbf16>
    tpu.vector_store %arg7[%c0_6, %c0_7], %9 {strides = array<i32>} : memref<16x128xbf16, #tpu.memory_space<vmem>>, vector<16x128xbf16>,
    %c0_8 = arith.constant 0 : index
    %c0_9 = arith.constant 0 : index
    %11 = vector.load %arg7[%c0_8, %c0_9] : memref<16x128xbf16, #tpu.memory_space<vmem>>, vector<16x128xbf16>
    %c0_10 = arith.constant 0 : index
    %c0_11 = arith.constant 0 : index
    %12 = vector.load %arg4[%c0_10, %c0_11] : memref<128x128xbf16, #tpu.memory_space<vmem>>, vector<128x128xbf16>
    %cst_12 = arith.constant dense<0.000000e+00> : vector<16x128xf32>
    %13 = tpu.matmul %11, %12, %cst_12 {dimension_numbers = #tpu.dot_dimension_numbers<[1], [0], [0], [1], [0, 0, 1, 1], [], []>} : vector<16x128xbf16>, vector<128x128xbf16>, vector<16x128xf32> -> vector<16x128xf32>
    %c0_13 = arith.constant 0 : index
    %c0_14 = arith.constant 0 : index
    %14 = vector.load %arg5[%c0_13, %c0_14] : memref<1x128xf32, #tpu.memory_space<vmem>>, vector<1x128xf32>
    %15 = vector.broadcast %14 : vector<1x128xf32> to vector<16x128xf32>
    %16 = arith.addf %13, %15 : vector<16x128xf32>
    %cst_15 = arith.constant 0.000000e+00 : f32
    %17 = vector.broadcast %cst_15 : f32 to vector<16x128xf32>
    %18 = arith.maximumf %16, %17 : vector<16x128xf32>
    %c0_16 = arith.constant 0 : index
    %c0_17 = arith.constant 0 : index
    %19 = vector.load %arg6[%c0_16, %c0_17] : memref<16x128xf32, #tpu.memory_space<vmem>>, vector<16x128xf32>
    tpu.vector_store %arg6[%c0_16, %c0_17], %18 {strides = array<i32>} : memref<16x128xf32, #tpu.memory_space<vmem>>, vector<16x128xf32>,
    return
  }
  func.func @transform_0(%arg0: i32) -> (i32, i32) {
    %c0_i32 = arith.constant 0 : i32
    %c0_i32_0 = arith.constant 0 : i32
    return %arg0, %c0_i32 : i32, i32
  }
  func.func @transform_1(%arg0: i32) -> (i32, i32) {
    %c0_i32 = arith.constant 0 : i32
    %c0_i32_0 = arith.constant 0 : i32
    %c0_i32_1 = arith.constant 0 : i32
    return %c0_i32, %c0_i32_0 : i32, i32
  }
  func.func @transform_2(%arg0: i32) -> (i32, i32) {
    %c0_i32 = arith.constant 0 : i32
    %c0_i32_0 = arith.constant 0 : i32
    %c0_i32_1 = arith.constant 0 : i32
    return %c0_i32, %c0_i32_0 : i32, i32
  }
  func.func @transform_3(%arg0: i32) -> (i32, i32) {
    %c0_i32 = arith.constant 0 : i32
    %c0_i32_0 = arith.constant 0 : i32
    %c0_i32_1 = arith.constant 0 : i32
    return %c0_i32, %c0_i32_0 : i32, i32
  }
  func.func @transform_4(%arg0: i32) -> (i32, i32) {
    %c0_i32 = arith.constant 0 : i32
    %c0_i32_0 = arith.constant 0 : i32
    %c0_i32_1 = arith.constant 0 : i32
    return %c0_i32, %c0_i32_0 : i32, i32
  }
  func.func @transform_5(%arg0: i32) -> (i32, i32) {
    %c0_i32 = arith.constant 0 : i32
    %c0_i32_0 = arith.constant 0 : i32
    return %arg0, %c0_i32 : i32, i32
  }
}

</mosaic_0001>

<bundles_post_ra>
// kernel: tpu_custom_call.1
= control target key start
LH: loop header
LB: loop body
LE: loop exit
PB: predicated region body
PF: predicated region fallthrough
CT: control target
= control target key end

     0   :  { %10 = vsyncpa [#allocation4], 0  ;;  %s922_s0 = inlined_call_operand.hbm [shape: f32[16,512], index: 0, kind: input, shape index: {}]   ;;  %s923_s1 = inlined_call_operand.hbm [shape: bf16[512,128], index: 1, kind: input, shape index: {}]   ;;  %s924_s2 = inlined_call_operand.vmem [shape: f32[1,128], index: 2, kind: input, shape index: {}]   ;;  %s925_s3 = inlined_call_operand.hbm [shape: bf16[128,128], index: 3, kind: input, shape index: {}]   ;;  %s926_s4 = inlined_call_operand.vmem [shape: f32[1,128], index: 4, kind: input, shape index: {}]   ;;  %s927_s5 = inlined_call_operand.hbm [shape: f32[16,128], index: 5, kind: output, shape index: {}]  }
   0x1   :  { %11 = vsyncpa [#allocation7], 0 }
   0x2   :  { %12 = vsyncpa [#allocation5], 0  ;;  %s820_s18 = smov [#allocation6]   ;;  %s726_s22 = scalar_lea.hbm %s923_s1, 4096 }
   0x3   :  { %s30_s19 = sshll.u32 %s820_s18, 4  ;;  %p727_p0 = scmp.ne.s32.totalorder %s923_s1, %s726_s22  ;;  %s31_s19 = int_to_ptr.vmem [resolvable:$true] %s30_s19 }
   0x4   :  { %p730_p1 = scmp.lt.u32.totalorder %s726_s22, %s923_s1 }
   0x6   :  { %p732_p2 = pnand %p730_p1, %p727_p0 }
   0x8   :  { %735 = shalt.err (!%p732_p2)
}
   0x9   :  { %s736_s27 = scalar_lea.vmem %s31_s19, 4096  ;;  %p741_p4 = scmp.lt.s32.totalorder %s31_s19, %s31_s19 }
   0xa   :  { %p737_p3 = scmp.ne.s32.totalorder %s31_s19, %s736_s27  ;;  %p742_p5 = scmp.lt.s32.totalorder %s736_s27, %s736_s27 }
   0xc   :  { %p743_p6 = por %p742_p5, %p741_p4 }
   0xe   :  { %p744_p7 = pnand %p743_p6, %p737_p3 }
  0x10   :  { %747 = shalt.err (!%p744_p7)
}
  0x11   :  { %s821_s28 = smov 64   ;;  %s822_s29 = smov 4  }
  0x12   :  { %36 = dma.hbm_to_vmem [thread:$0]  %s923_s1, 4096, %s31_s19, [#allocation7], %s821_s28, %s821_s28, %s822_s29  }
  0x13   :  { %s823_s7 = smov [#allocation3]   ;;  %s748_s11 = scalar_lea.hbm %s922_s0, 1024 }
  0x14   :  { %s18_s8 = sshll.u32 %s823_s7, 4  ;;  %p749_p8 = scmp.ne.s32.totalorder %s922_s0, %s748_s11  ;;  %s19_s8 = int_to_ptr.vmem [resolvable:$true] %s18_s8 }
  0x15   :  { %p752_p9 = scmp.lt.u32.totalorder %s748_s11, %s922_s0 }
  0x17   :  { %p754_p10 = pnand %p752_p9, %p749_p8 }
  0x19   :  { %757 = shalt.err (!%p754_p10)
}
  0x1a   :  { %s758_s16 = scalar_lea.vmem %s19_s8, 1024  ;;  %p763_p12 = scmp.lt.s32.totalorder %s19_s8, %s19_s8 }
  0x1b   :  { %p759_p11 = scmp.ne.s32.totalorder %s19_s8, %s758_s16  ;;  %p764_p13 = scmp.lt.s32.totalorder %s758_s16, %s758_s16 }
  0x1d   :  { %p765_p0 = por %p764_p13, %p763_p12 }
  0x1f   :  { %p766_p1 = pnand %p765_p0, %p759_p11 }
  0x21   :  { %769 = shalt.err (!%p766_p1)
}
  0x22   :  { %s824_s1 = smov 512   ;;  %s825_s17 = smov 32  }
  0x23   :  { %24 = dma.hbm_to_vmem [thread:$0]  %s922_s0, 1024, %s19_s8, [#allocation4], %s824_s1, %s824_s1, %s825_s17  }
  0x24   :  { %s826_s20 = smov [#allocation8]   ;;  %s770_s24 = scalar_lea.hbm %s925_s3, 1024 }
  0x25   :  { %s44_s21 = sshll.u32 %s826_s20, 4  ;;  %p771_p2 = scmp.ne.s32.totalorder %s925_s3, %s770_s24  ;;  %s45_s21 = int_to_ptr.vmem [resolvable:$true] %s44_s21 }
  0x26   :  { %p774_p3 = scmp.lt.u32.totalorder %s770_s24, %s925_s3 }
  0x28   :  { %p776_p4 = pnand %p774_p3, %p771_p2 }
  0x2a   :  { %779 = shalt.err (!%p776_p4)
}
  0x2b   :  { %s780_s6 = scalar_lea.vmem %s45_s21, 1024  ;;  %p785_p6 = scmp.lt.s32.totalorder %s45_s21, %s45_s21 }
  0x2c   :  { %p781_p5 = scmp.ne.s32.totalorder %s45_s21, %s780_s6  ;;  %p786_p7 = scmp.lt.s32.totalorder %s780_s6, %s780_s6 }
  0x2e   :  { %p787_p8 = por %p786_p7, %p785_p6 }
  0x30   :  { %p788_p9 = pnand %p787_p8, %p781_p5 }
  0x32   :  { %791 = shalt.err (!%p788_p9)
}
  0x33   :  { %50 = dma.hbm_to_vmem [thread:$0]  %s925_s3, 1024, %s45_s21, [#allocation7], %s821_s28, %s821_s28, %s822_s29  }
  0x34   :  { %814 = dma.done.wait [#allocation4], 1024  }
  0x35   :  { %815 = vsyncadd [#allocation4], 4294966272 }
  0x36   :  { %816 = dma.done.wait [#allocation7], 5120  }
  0x37   :  { %817 = vsyncadd [#allocation7], 4294962176  ;;  %v686_v0 = vld [vmem:[#allocation6 + $0x40] sm:$0xff]   ;;  %v690_v4 = vld [vmem:[#allocation6 + $0x48] sm:$0xff]   ;;  %v827_v39 = vmov 0.0   ;;  %vm828_vm0 = vmmov 0  }
  0x38   :  { %v687_v1 = vld [vmem:[#allocation6 + $0xc0] sm:$0xff]   ;;  %601 = vmatprep.subr.bf16.mxu0 %v686_v0  ;;  %v691_v5 = vld [vmem:[#allocation6 + $0xc8] sm:$0xff]   ;;  %v694_v8 = vld [vmem:[#allocation6 + $0x50] sm:$0xff]   ;;  %s829_s8 = smov [#allocation9]  }
  0x39   :  { %v688_v2 = vld [vmem:[#allocation6] sm:$0xff]   ;;  %623 = vmatprep.subr.bf16.mxu1 %v687_v1  ;;  %v692_v6 = vld [vmem:[#allocation6 + $0x8] sm:$0xff]   ;;  %v695_v9 = vld [vmem:[#allocation6 + $0xd0] sm:$0xff]   ;;  %s546_s9 = sshll.u32 %s829_s8, 4  ;;  %s547_s9 = int_to_ptr.vmem [resolvable:$true] %s546_s9 }
  0x3a   :  { %v689_v3 = vld [vmem:[#allocation6 + $0x80] sm:$0xff]   ;;  %602 = vmatpush3.bf16.msra.mxu0 %v688_v2  ;;  %v693_v7 = vld [vmem:[#allocation6 + $0x88] sm:$0xff]   ;;  %v696_v10 = vld [vmem:[#allocation6 + $0x10] sm:$0xff]   ;;  %s792_s10 = scalar_lea.vmem %s547_s9, 256  ;;  %p797_p11 = scmp.lt.s32.totalorder %s547_s9, %s547_s9 }
  0x3b   :  { %624 = vmatpush3.bf16.msra.mxu1 %v689_v3  ;;  %603 = vmatprep.subr.bf16.mxu0 %v690_v4  ;;  %v697_v11 = vld [vmem:[#allocation6 + $0x90] sm:$0xff]   ;;  %v698_v12 = vld [vmem:[#allocation6 + $0x58] sm:$0xff]   ;;  %v702_v16 = vld [vmem:[#allocation6 + $0x60] sm:$0xff]   ;;  %p793_p10 = scmp.ne.s32.totalorder %s547_s9, %s792_s10  ;;  %p798_p12 = scmp.lt.s32.totalorder %s792_s10, %s792_s10 }
  0x3c   :  { %625 = vmatprep.subr.bf16.mxu1 %v691_v5  ;;  %v699_v13 = vld [vmem:[#allocation6 + $0xd8] sm:$0xff]   ;;  %v703_v17 = vld [vmem:[#allocation6 + $0xe0] sm:$0xff]   ;;  %v706_v20 = vld [vmem:[#allocation6 + $0x68] sm:$0xff]  }
  0x3d   :  { %v700_v14 = vld [vmem:[#allocation6 + $0x18] sm:$0xff]   ;;  %v704_v18 = vld [vmem:[#allocation6 + $0x20] sm:$0xff]   ;;  %v707_v21 = vld [vmem:[#allocation6 + $0xe8] sm:$0xff]   ;;  %p799_p13 = por %p798_p12, %p797_p11 }
  0x3e   :  { %604 = vmatpush3.bf16.msra.mxu0 %v692_v6  ;;  %v701_v15 = vld [vmem:[#allocation6 + $0x98] sm:$0xff]   ;;  %v705_v19 = vld [vmem:[#allocation6 + $0xa0] sm:$0xff]   ;;  %v708_v22 = vld [vmem:[#allocation6 + $0x28] sm:$0xff]  }
  0x3f   :  { %626 = vmatpush3.bf16.msra.mxu1 %v693_v7  ;;  %605 = vmatprep.subr.bf16.mxu0 %v694_v8  ;;  %v709_v23 = vld [vmem:[#allocation6 + $0xa8] sm:$0xff]   ;;  %v710_v24 = vld [vmem:[#allocation6 + $0x70] sm:$0xff]   ;;  %v714_v28 = vld [vmem:[#allocation6 + $0x78] sm:$0xff]   ;;  %p800_p0 = pnand %p799_p13, %p793_p10 }
  0x40   :  { %627 = vmatprep.subr.bf16.mxu1 %v695_v9  ;;  %v711_v25 = vld [vmem:[#allocation6 + $0xf0] sm:$0xff]   ;;  %v715_v29 = vld [vmem:[#allocation6 + $0xf8] sm:$0xff]   ;;  %v64_v32 = vld [vmem:[#allocation3 + $0x8] sm:$0xff] }
  0x41   :  { %v712_v26 = vld [vmem:[#allocation6 + $0x30] sm:$0xff]   ;;  %v716_v30 = vld [vmem:[#allocation6 + $0x38] sm:$0xff]   ;;  %v68_v33 = vld [vmem:[#allocation3 + $0x28] sm:$0xff] }
  0x42   :  { %606 = vmatpush3.bf16.msra.mxu0 %v696_v10  ;;  %v713_v27 = vld [vmem:[#allocation6 + $0xb0] sm:$0xff]   ;;  %v717_v31 = vld [vmem:[#allocation6 + $0xb8] sm:$0xff]   ;;  %v72_v35 = vpack.c.bf16 %v68_v33, %v64_v32  ;;  %v63_v37 = vld [vmem:[#allocation3] sm:$0xff] }
  0x43   :  { %628 = vmatpush3.bf16.msra.mxu1 %v697_v11  ;;  %607 = vmatprep.subr.bf16.mxu0 %v698_v12  ;;  %v66_v34 = vld [vmem:[#allocation3 + $0x18] sm:$0xff]  ;;  %v67_v38 = vld [vmem:[#allocation3 + $0x20] sm:$0xff]  ;;  %v65_v42 = vld [vmem:[#allocation3 + $0x10] sm:$0xff] }
  0x44   :  { %629 = vmatprep.subr.bf16.mxu1 %v699_v13  ;;  %v70_v36 = vld [vmem:[#allocation3 + $0x38] sm:$0xff]  ;;  %v71_v41 = vpack.c.bf16 %v67_v38, %v63_v37  ;;  %v69_v43 = vld [vmem:[#allocation3 + $0x30] sm:$0xff]  ;;  %370 = vmatprep.mubr.bf16.mxu0 %v72_v35  ;;  %v718_v45 = vld [vmem:[#allocation8] sm:$0xff]  }
  0x45   :  { %v74_v40 = vpack.c.bf16 %v70_v36, %v66_v34  ;;  %v73_v44 = vpack.c.bf16 %v69_v43, %v65_v42  ;;  %v719_v46 = vld [vmem:[#allocation8 + $0x8] sm:$0xff]   ;;  %v720_v47 = vld [vmem:[#allocation8 + $0x10] sm:$0xff]   ;;  %v721_v48 = vld [vmem:[#allocation8 + $0x18] sm:$0xff]  }
  0x46   :  { %608 = vmatpush3.bf16.msra.mxu0 %v700_v14  ;;  %v722_v49 = vld [vmem:[#allocation8 + $0x20] sm:$0xff]   ;;  %v723_v50 = vld [vmem:[#allocation8 + $0x28] sm:$0xff]   ;;  %v724_v51 = vld [vmem:[#allocation8 + $0x30] sm:$0xff]  }
  0x47   :  { %630 = vmatpush3.bf16.msra.mxu1 %v701_v15  ;;  %609 = vmatprep.subr.bf16.mxu0 %v702_v16  ;;  %v725_v52 = vld [vmem:[#allocation8 + $0x38] sm:$0xff]   ;;  %v559_v55 = vld [vmem:[%s924_s2] ss:$0 sm:$0xff] }
  0x48   :  { %631 = vmatprep.subr.bf16.mxu1 %v703_v17  ;;  %411 = vmatprep.mubr.bf16.mxu1 %v74_v40  ;;  %v592_v9 = vld [vmem:[%s926_s4] ss:$0 sm:$0xff] }
  0x4a   :  { %610 = vmatpush3.bf16.msra.mxu0 %v704_v18 }
  0x4b   :  { %632 = vmatpush3.bf16.msra.mxu1 %v705_v19  ;;  %611 = vmatprep.subr.bf16.mxu0 %v706_v20 }
  0x4c   :  { %633 = vmatprep.subr.bf16.mxu1 %v707_v21 }
  0x4e   :  { %612 = vmatpush3.bf16.msra.mxu0 %v708_v22 }
  0x4f   :  { %634 = vmatpush3.bf16.msra.mxu1 %v709_v23  ;;  %613 = vmatprep.subr.bf16.mxu0 %v710_v24 }
  0x50   :  { %635 = vmatprep.subr.bf16.mxu1 %v711_v25 }
  0x52   :  { %614 = vmatpush3.bf16.msra.mxu0 %v712_v26 }
  0x53   :  { %636 = vmatpush3.bf16.msra.mxu1 %v713_v27  ;;  %615 = vmatprep.subr.bf16.mxu0 %v714_v28 }
  0x54   :  { %637 = vmatprep.subr.bf16.mxu1 %v715_v29 }
  0x56   :  { %616 = vmatpush3.bf16.msra.mxu0 %v716_v30 }
  0x57   :  { %638 = vmatpush3.bf16.msra.mxu1 %v717_v31  ;;  %654 = vmatprep.subr.bf16.mxu0 %v827_v39 }
  0x59   :  { %371 = vmatmul.mubr.bf16.vlgmr.msra.gmra.mrb[0].mxu0 %v71_v41 }
  0x5a   :  { %412 = vmatmul.mubr.bf16.vlgmr.msra.gmra.mrb[0].mxu1 %v73_v44  ;;  %655 = vmatpush3.bf16.msra.mxu0 %v718_v45 }
  0x5b   :  { %656 = vmatprep.subr.bf16.mxu0 %v827_v39  ;;  %670 = vmatprep.mubr.msk.bf16.mxu0 %vm828_vm0, %v827_v39 }
  0x5e   :  { %657 = vmatpush3.bf16.msra.mxu0 %v719_v46 }
  0x5f   :  { %658 = vmatprep.subr.bf16.mxu0 %v827_v39 }
  0x62   :  { %659 = vmatpush3.bf16.msra.mxu0 %v720_v47 }
  0x63   :  { %660 = vmatprep.subr.bf16.mxu0 %v827_v39 }
  0x66   :  { %661 = vmatpush3.bf16.msra.mxu0 %v721_v48 }
  0x67   :  { %662 = vmatprep.subr.bf16.mxu0 %v827_v39 }
  0x6a   :  { %663 = vmatpush3.bf16.msra.mxu0 %v722_v49 }
  0x6b   :  { %664 = vmatprep.subr.bf16.mxu0 %v827_v39 }
  0x6e   :  { %665 = vmatpush3.bf16.msra.mxu0 %v723_v50 }
  0x6f   :  { %666 = vmatprep.subr.bf16.mxu0 %v827_v39 }
  0x72   :  { %667 = vmatpush3.bf16.msra.mxu0 %v724_v51 }
  0x73   :  { %668 = vmatprep.subr.bf16.mxu0 %v827_v39 }
  0x76   :  { %669 = vmatpush3.bf16.msra.mxu0 %v725_v52 }
 0x12c   :  { %v617_v53 = vpop.f32.mrb[0].mxu0 }
 0x12d   :  { %v639_v54 = vpop.f32.mrb[0].mxu1  ;;  %v618_v56 = vpop.f32.mrb[1].mxu0 }
 0x12e   :  { %v619_v57 = vadd.f32 %v618_v56, %v617_v53  ;;  %v640_v58 = vpop.f32.mrb[1].mxu1  ;;  %v620_v59 = vpop.f32.mrb[2].mxu0 }
 0x12f   :  { %v641_v60 = vadd.f32 %v640_v58, %v639_v54  ;;  %v642_v61 = vpop.f32.mrb[2].mxu1  ;;  %v621_v62 = vpop.f32.mrb[3].mxu0 }
 0x130   :  { %v373_v63 = vadd.f32 %v619_v57, %v559_v55  ;;  %v622_v0 = vadd.f32 %v621_v62, %v620_v59  ;;  %v643_v1 = vpop.f32.mrb[3].mxu1 }
 0x131   :  { %v644_v2 = vadd.f32 %v643_v1, %v642_v61 }
 0x132   :  { %v414_v3 = vadd.f32 %v641_v60, %v373_v63  ;;  %v376_v4 = vadd.f32 %v622_v0, %v559_v55 }
 0x134   :  { %v417_v5 = vadd.f32 %v644_v2, %v376_v4  ;;  %v420_v6 = vmax.f32 %v414_v3, 0.0 }
 0x136   :  { %v421_v7 = vmax.f32 %v417_v5, 0.0 }
 0x138   :  { %v422_v8 = vpack.c.bf16 %v421_v7, %v420_v6 }
 0x13a   :  { %671 = vmatmul.mubr.bf16.vlgmr.msra.gmra.mrb[4].mxu0 %v422_v8 }
 0x20d   :  { %v530_v10 = vpop.f32.mrb[4].mxu0 }
 0x20e   :  { %v531_v11 = vadd.f32 %v592_v9, %v530_v10  ;;  %v672_v12 = vpop.f32.mrb[5].mxu0 }
 0x20f   :  { %v533_v13 = vpop.f32.mrb[6].mxu0 }
 0x210   :  { %v537_v14 = vmax.f32 %v531_v11, 0.0  ;;  %v534_v15 = vadd.f32 %v592_v9, %v533_v13  ;;  %v673_v16 = vpop.f32.mrb[7].mxu0 }
 0x212   :  { %539 = vst [vmem:[#allocation9] sm:$0xff] %v537_v14  ;;  %v538_v17 = vmax.f32 %v534_v15, 0.0 }
 0x214   :  { %540 = vst [vmem:[#allocation9 + $0x8] sm:$0xff] %v538_v17 }
 0x215   :  { %803 = shalt.err (!%p800_p0)
}
 0x216   :  { %s804_s12 = scalar_lea.hbm %s927_s5, 256 }
 0x217   :  { %p805_p1 = scmp.ne.s32.totalorder %s927_s5, %s804_s12  ;;  %p808_p2 = scmp.lt.u32.totalorder %s804_s12, %s927_s5 }
 0x219   :  { %p810_p3 = pnand %p808_p2, %p805_p1 }
 0x21b   :  { %813 = shalt.err (!%p810_p3)
}
 0x21c   :  { %s830_s1 = smov 128   ;;  %s831_s17 = smov 8  }
 0x21d   :  { %552 = dma.vmem_to_hbm [thread:$0]  %s547_s9, 256, %s927_s5, [#allocation5], %s830_s1, %s830_s1, %s831_s17  }
 0x21e   :  { %818 = dma.done.wait [#allocation5], 256  }
 0x21f   :  { %819 = vsyncadd [#allocation5], 4294967040 }
 0x220   :  { %556 = vsyncpa [#allocation4], 1 }
 0x221   :  { %557 = vsyncpa [#allocation7], 1 }
 0x222   :  { %558 = vsyncpa [#allocation5], 1 }

</bundles_post_ra>
